<compile_context>
chip_gen: v7x
topology: tpu7x:2x2x1
jax: 0.10.0
libtpu: 0.0.40
codegen_flags: <defaults>
</compile_context>

<pallas_src>
import jax
import jax.numpy as jnp
import numpy as np
from jax import lax
from jax.experimental import pallas as pl
from jax.experimental.pallas import tpu as pltpu


def _build_masks(H, W, n_tile, dtype):
    """(9, n_tile*H*W) per-tap validity masks for a stride-1, pad-1 3x3 conv."""
    HW = H * W
    hh = np.arange(HW) // W
    ww = np.arange(HW) % W
    rows = []
    for dh in range(3):
        for dw in range(3):
            m = np.ones(HW, np.float32)
            if dh == 0:
                m = m * (hh >= 1)
            if dh == 2:
                m = m * (hh <= H - 2)
            if dw == 0:
                m = m * (ww >= 1)
            if dw == 2:
                m = m * (ww <= W - 2)
            rows.append(np.tile(m, n_tile))
    return jnp.asarray(np.stack(rows, 0), dtype=dtype)


def _pick_batch_block(N, HW, per_lane_bytes, budget_bytes):
    """Pick Nb s.t. N % Nb == 0 and (Nb*HW) % 128 == 0, targeting >=512 lanes
    under the VMEM budget, preferring >= 2 grid steps.  None if impossible."""
    cands = [nb for nb in range(1, N + 1)
             if N % nb == 0 and (nb * HW) % 128 == 0]
    if not cands:
        return None
    under = [nb for nb in cands
             if nb * HW * per_lane_bytes <= budget_bytes] or cands[:1]
    for nb in under:
        if nb * HW >= 512 and (N // nb) >= 2:
            return nb
    for nb in under:
        if nb * HW >= 512:
            return nb
    return under[-1]


def basic_block_pallas(x_nchw, params, *, compute_dtype=jnp.bfloat16,
                       batch_block=None):
    """params: w1 (Cout,Cin,3,3), w2 (Cout,Cout,3,3) OIHW; s*/b* folded BN vecs."""
    w1 = jnp.asarray(params["w1"])
    w2 = jnp.asarray(params["w2"])
    N, Cin, H, W = x_nchw.shape
    Cout = w1.shape[0]
    if Cout < Cin:
        raise NotImplementedError("planes < inplanes not supported")
    HW = H * W
    cd_bytes = np.dtype(compute_dtype).itemsize

    # Per-lane VMEM estimate: double-buffered in/out blocks + resident masks
    # + stacked conv operands + f32 intermediates.
    per_lane = (2 * Cin * 4 + 2 * Cout * 4
                + 2 * 9 * cd_bytes
                + 9 * (Cin + Cout) * cd_bytes
                + 4 * Cout * 4)
    budget = 24 << 20

    Nb = batch_block
    if Nb is None or Nb <= 0 or N % Nb != 0 or (Nb * HW) % 128 != 0:
        Nb = _pick_batch_block(N, HW, per_lane, budget)
    if Nb is None:
        Nb = N                      # last resort: one lane-padded full tile
    L = Nb * HW

    weight_bytes = 2 * 9 * (Cin + Cout) * Cout * cd_bytes
    est = per_lane * L + weight_bytes + (1 << 20)
    vmem_limit = None
    if est > (12 << 20):
        vmem_limit = int(min(max(2 * est, 32 << 20), 48 << 20))

    # Channel-major flattening (layout plumbing; see TODO above).
    x2 = jnp.transpose(x_nchw, (1, 0, 2, 3)).reshape(Cin, N * HW)
    x2 = x2.astype(jnp.float32)

    # Pre-folded weights: (Cout, C, 3, 3) -> (Cout, 9*C), tap-major /
    # channel-minor — matches the in-kernel concatenation order (k = dh*3+dw).
    w1f = jnp.transpose(w1, (0, 2, 3, 1)).reshape(Cout, 9 * Cin)
    w1f = w1f.astype(compute_dtype)
    w2f = jnp.transpose(w2, (0, 2, 3, 1)).reshape(Cout, 9 * Cout)
    w2f = w2f.astype(compute_dtype)

    # Pack the six folded-BN vectors into one (Cout, 8) slab.
    def _pad_c(v):
        v = jnp.asarray(v, jnp.float32)
        return jnp.pad(v, (0, Cout - v.shape[0]))
    zero_c = jnp.zeros((Cout,), jnp.float32)
    bn = jnp.stack([_pad_c(params["s1"]), _pad_c(params["b1"]),
                    _pad_c(params["s2"]), _pad_c(params["b2"]),
                    _pad_c(params["s3"]), _pad_c(params["b3"]),
                    zero_c, zero_c], axis=1)                    # (Cout, 8)

    masks = _build_masks(H, W, L // HW, compute_dtype)           # (9, L)

    tap_offsets = [(dh - 1) * W + (dw - 1) for dh in range(3) for dw in range(3)]

    def kernel(x_ref, w1_ref, w2_ref, bn_ref, mask_ref, out_ref):
        x = x_ref[...]                                  # (Cin, L) f32
        bnv = bn_ref[...]                               # (Cout, 8) f32
        s1, b1 = bnv[0:Cin, 0:1], bnv[0:Cin, 1:2]
        s2, b2 = bnv[:, 2:3], bnv[:, 3:4]
        s3, b3 = bnv[:, 4:5], bnv[:, 5:6]
        mask = mask_ref[...]                            # (9, L) compute_dtype

        def conv3x3(act, w_ref):
            # act: (C, L) in compute_dtype.  Build the (9*C, L) stacked
            # operand (roll = XLU, mask = one VPU multiply per non-center tap)
            # and do a single MXU matmul with K = 9*C.
            taps = []
            for k, off in enumerate(tap_offsets):
                xs = act if off == 0 else pltpu.roll(act, shift=(-off) % L,
                                                     axis=1)
                if k != 4:                              # center tap: no mask
                    xs = xs * mask[k:k + 1, :]
                taps.append(xs)
            stk = jnp.concatenate(taps, axis=0)         # (9*C, L)
            return jnp.dot(w_ref[...], stk,
                           preferred_element_type=jnp.float32)

        y = (x * s1 + b1).astype(compute_dtype)                      # bn1
        acc1 = conv3x3(y, w1_ref)                                    # conv1
        z = jnp.maximum(acc1 * s2 + b2, 0.0).astype(compute_dtype)   # bn2+relu
        acc2 = conv3x3(z, w2_ref)                                    # conv2
        res = acc2 * s3 + b3                                         # bn3

        # Residual with torch.cat-style zero channel padding (in-kernel).
        if Cout == Cin:
            shortcut = x
        else:
            shortcut = jnp.concatenate(
                [x, jnp.zeros((Cout - Cin, L), jnp.float32)], axis=0)
        out_ref[...] = (res + shortcut).astype(out_ref.dtype)

    out2 = pl.pallas_call(
        kernel,
        out_shape=jax.ShapeDtypeStruct((Cout, N * HW), jnp.float32),
        grid_spec=pltpu.PrefetchScalarGridSpec(
            num_scalar_prefetch=0,
            grid=(N * HW // L,),
            in_specs=[
                pl.BlockSpec((Cin, L), lambda i: (0, i)),
                pl.BlockSpec((Cout, 9 * Cin), lambda i: (0, 0)),
                pl.BlockSpec((Cout, 9 * Cout), lambda i: (0, 0)),
                pl.BlockSpec((Cout, 8), lambda i: (0, 0)),
                pl.BlockSpec((9, L), lambda i: (0, 0)),
            ],
            out_specs=pl.BlockSpec((Cout, L), lambda i: (0, i)),
        ),
        compiler_params=pltpu.CompilerParams(
            dimension_semantics=("parallel",),
            vmem_limit_bytes=vmem_limit),
    )(x2, w1f, w2f, bn, masks)

    out = jnp.transpose(out2.reshape(Cout, N, H, W), (1, 0, 2, 3))
    return out.astype(x_nchw.dtype)


def ref_forward(x, w1_oihw, w2_oihw, s1, b1, s2, b2, s3, b3):
    """Pure-JAX reference (NCHW, PyTorch-equivalent semantics, eval-mode BN)."""
    def bn(t, s, b):
        return t * s[None, :, None, None] + b[None, :, None, None]

    dn = ("NCHW", "OIHW", "NCHW")
    out = bn(x, s1, b1)
    out = lax.conv_general_dilated(out, w1_oihw, (1, 1), ((1, 1), (1, 1)),
                                   dimension_numbers=dn)
    out = jnp.maximum(bn(out, s2, b2), 0.0)
    out = lax.conv_general_dilated(out, w2_oihw, (1, 1), ((1, 1), (1, 1)),
                                   dimension_numbers=dn)
    out = bn(out, s3, b3)
    Cin, Cout = x.shape[1], out.shape[1]
    if Cout != Cin:
        shortcut = jnp.pad(x, ((0, 0), (0, Cout - Cin), (0, 0), (0, 0)))
    else:
        shortcut = x
    return out + shortcut


if __name__ == "__main__":
    key = jax.random.PRNGKey(0)
    N, Cin, H, W = 4, 4, 16, 16   # batch, inplanes, spatial
    Cout = 8                      # planes (!= inplanes -> exercises the zero-pad shortcut)
    eps = 1e-5

    ks = jax.random.split(key, 15)
    x = jax.random.normal(ks[0], (N, Cin, H, W), jnp.float32)
    w1 = jax.random.normal(ks[1], (Cout, Cin, 3, 3), jnp.float32) * 0.1
    w2 = jax.random.normal(ks[2], (Cout, Cout, 3, 3), jnp.float32) * 0.1

    def make_bn(kg, kb, km, kv, C):
        gamma = jax.random.uniform(kg, (C,), jnp.float32, 0.5, 1.5)
        beta = jax.random.normal(kb, (C,), jnp.float32) * 0.1
        mean = jax.random.normal(km, (C,), jnp.float32) * 0.1
        var = jax.random.uniform(kv, (C,), jnp.float32, 0.5, 1.5)
        scale = gamma / jnp.sqrt(var + eps)
        shift = beta - mean * scale
        return scale, shift

    s1, b1 = make_bn(ks[3], ks[4], ks[5], ks[6], Cin)
    s2, b2 = make_bn(ks[7], ks[8], ks[9], ks[10], Cout)
    s3, b3 = make_bn(ks[11], ks[12], ks[13], ks[14], Cout)

    params = dict(w1=w1, w2=w2, s1=s1, b1=b1, s2=s2, b2=b2, s3=s3, b3=b3)

    ref = jax.block_until_ready(
        ref_forward(x, w1, w2, s1, b1, s2, b2, s3, b3))

    # Tight check on the f32 MXU path.
    out_f32 = jax.block_until_ready(
        basic_block_pallas(x, params, compute_dtype=jnp.float32))
    np.testing.assert_allclose(np.asarray(out_f32), np.asarray(ref),
                               rtol=1e-4, atol=1e-4)

    # Loose sanity check on the default bf16 MXU path (f32 accumulation).
    out_bf16 = jax.block_until_ready(basic_block_pallas(x, params))
    np.testing.assert_allclose(np.asarray(out_bf16), np.asarray(ref),
                               rtol=1e-1, atol=1e-1)

    print("KERNEL_OK")
</pallas_src>

<mosaic_0001>
module attributes {stable_mosaic.version = 11 : i64} {
  func.func @kernel(%arg0: i32, %arg1: memref<4x512xf32, #tpu.memory_space<vmem>>, %arg2: memref<8x36xf32, #tpu.memory_space<vmem>>, %arg3: memref<8x72xf32, #tpu.memory_space<vmem>>, %arg4: memref<8x8xf32, #tpu.memory_space<vmem>>, %arg5: memref<9x512xf32, #tpu.memory_space<vmem>>, %arg6: memref<8x512xf32, #tpu.memory_space<vmem>>) attributes {dimension_semantics = [#tpu.dimension_semantics<parallel>], iteration_bounds = array<i64: 2>, scalar_prefetch = 0 : i64, scratch_operands = 0 : i64, tpu.core_type = #tpu.core_type<tc>, window_params = [{transform_indices = @transform_0, window_bounds = array<i64: 4, 512>}, {pipeline_mode = #tpu.pipeline_mode<synchronous>, transform_indices = @transform_1, window_bounds = array<i64: 8, 36>}, {pipeline_mode = #tpu.pipeline_mode<synchronous>, transform_indices = @transform_2, window_bounds = array<i64: 8, 72>}, {pipeline_mode = #tpu.pipeline_mode<synchronous>, transform_indices = @transform_3, window_bounds = array<i64: 8, 8>}, {pipeline_mode = #tpu.pipeline_mode<synchronous>, transform_indices = @transform_4, window_bounds = array<i64: 9, 512>}, {transform_indices = @transform_5, window_bounds = array<i64: 8, 512>}]} {
    %c0 = arith.constant 0 : index
    %c0_0 = arith.constant 0 : index
    %0 = vector.load %arg1[%c0, %c0_0] : memref<4x512xf32, #tpu.memory_space<vmem>>, vector<4x512xf32>
    %c0_1 = arith.constant 0 : index
    %c0_2 = arith.constant 0 : index
    %1 = vector.load %arg4[%c0_1, %c0_2] : memref<8x8xf32, #tpu.memory_space<vmem>>, vector<8x8xf32>
    %2 = vector.extract_strided_slice %1 {offsets = [0, 0], sizes = [4, 1], strides = [1, 1]} : vector<8x8xf32> to vector<4x1xf32>
    %3 = vector.extract_strided_slice %1 {offsets = [0, 1], sizes = [4, 1], strides = [1, 1]} : vector<8x8xf32> to vector<4x1xf32>
    %4 = vector.extract_strided_slice %1 {offsets = [0, 2], sizes = [8, 1], strides = [1, 1]} : vector<8x8xf32> to vector<8x1xf32>
    %5 = vector.extract_strided_slice %1 {offsets = [0, 3], sizes = [8, 1], strides = [1, 1]} : vector<8x8xf32> to vector<8x1xf32>
    %6 = vector.extract_strided_slice %1 {offsets = [0, 4], sizes = [8, 1], strides = [1, 1]} : vector<8x8xf32> to vector<8x1xf32>
    %7 = vector.extract_strided_slice %1 {offsets = [0, 5], sizes = [8, 1], strides = [1, 1]} : vector<8x8xf32> to vector<8x1xf32>
    %c0_3 = arith.constant 0 : index
    %c0_4 = arith.constant 0 : index
    %8 = vector.load %arg5[%c0_3, %c0_4] : memref<9x512xf32, #tpu.memory_space<vmem>>, vector<9x512xf32>
    %9 = vector.broadcast %2 : vector<4x1xf32> to vector<4x512xf32>
    %10 = arith.mulf %0, %9 : vector<4x512xf32>
    %11 = vector.broadcast %3 : vector<4x1xf32> to vector<4x512xf32>
    %12 = arith.addf %10, %11 : vector<4x512xf32>
    %c17_i32 = arith.constant 17 : i32
    %13 = tpu.dynamic_rotate %12 by %c17_i32 dim 1 : vector<4x512xf32>, i32 -> vector<4x512xf32>
    %14 = vector.extract_strided_slice %8 {offsets = [0, 0], sizes = [1, 512], strides = [1, 1]} : vector<9x512xf32> to vector<1x512xf32>
    %15 = vector.broadcast %14 : vector<1x512xf32> to vector<4x512xf32>
    %16 = arith.mulf %13, %15 : vector<4x512xf32>
    %c16_i32 = arith.constant 16 : i32
    %17 = tpu.dynamic_rotate %12 by %c16_i32 dim 1 : vector<4x512xf32>, i32 -> vector<4x512xf32>
    %18 = vector.extract_strided_slice %8 {offsets = [1, 0], sizes = [1, 512], strides = [1, 1]} : vector<9x512xf32> to vector<1x512xf32>
    %19 = vector.broadcast %18 : vector<1x512xf32> to vector<4x512xf32>
    %20 = arith.mulf %17, %19 : vector<4x512xf32>
    %c15_i32 = arith.constant 15 : i32
    %21 = tpu.dynamic_rotate %12 by %c15_i32 dim 1 : vector<4x512xf32>, i32 -> vector<4x512xf32>
    %22 = vector.extract_strided_slice %8 {offsets = [2, 0], sizes = [1, 512], strides = [1, 1]} : vector<9x512xf32> to vector<1x512xf32>
    %23 = vector.broadcast %22 : vector<1x512xf32> to vector<4x512xf32>
    %24 = arith.mulf %21, %23 : vector<4x512xf32>
    %c1_i32 = arith.constant 1 : i32
    %25 = tpu.dynamic_rotate %12 by %c1_i32 dim 1 : vector<4x512xf32>, i32 -> vector<4x512xf32>
    %26 = vector.extract_strided_slice %8 {offsets = [3, 0], sizes = [1, 512], strides = [1, 1]} : vector<9x512xf32> to vector<1x512xf32>
    %27 = vector.broadcast %26 : vector<1x512xf32> to vector<4x512xf32>
    %28 = arith.mulf %25, %27 : vector<4x512xf32>
    %c511_i32 = arith.constant 511 : i32
    %29 = tpu.dynamic_rotate %12 by %c511_i32 dim 1 : vector<4x512xf32>, i32 -> vector<4x512xf32>
    %30 = vector.extract_strided_slice %8 {offsets = [5, 0], sizes = [1, 512], strides = [1, 1]} : vector<9x512xf32> to vector<1x512xf32>
    %31 = vector.broadcast %30 : vector<1x512xf32> to vector<4x512xf32>
    %32 = arith.mulf %29, %31 : vector<4x512xf32>
    %c497_i32 = arith.constant 497 : i32
    %33 = tpu.dynamic_rotate %12 by %c497_i32 dim 1 : vector<4x512xf32>, i32 -> vector<4x512xf32>
    %34 = vector.extract_strided_slice %8 {offsets = [6, 0], sizes = [1, 512], strides = [1, 1]} : vector<9x512xf32> to vector<1x512xf32>
    %35 = vector.broadcast %34 : vector<1x512xf32> to vector<4x512xf32>
    %36 = arith.mulf %33, %35 : vector<4x512xf32>
    %c496_i32 = arith.constant 496 : i32
    %37 = tpu.dynamic_rotate %12 by %c496_i32 dim 1 : vector<4x512xf32>, i32 -> vector<4x512xf32>
    %38 = vector.extract_strided_slice %8 {offsets = [7, 0], sizes = [1, 512], strides = [1, 1]} : vector<9x512xf32> to vector<1x512xf32>
    %39 = vector.broadcast %38 : vector<1x512xf32> to vector<4x512xf32>
    %40 = arith.mulf %37, %39 : vector<4x512xf32>
    %c495_i32 = arith.constant 495 : i32
    %41 = tpu.dynamic_rotate %12 by %c495_i32 dim 1 : vector<4x512xf32>, i32 -> vector<4x512xf32>
    %42 = vector.extract_strided_slice %8 {offsets = [8, 0], sizes = [1, 512], strides = [1, 1]} : vector<9x512xf32> to vector<1x512xf32>
    %43 = vector.broadcast %42 : vector<1x512xf32> to vector<4x512xf32>
    %44 = arith.mulf %41, %43 : vector<4x512xf32>
    %45 = tpu.concatenate %16, %20, %24, %28, %12, %32, %36, %40, %44 in 0 : vector<4x512xf32>, vector<4x512xf32>, vector<4x512xf32>, vector<4x512xf32>, vector<4x512xf32>, vector<4x512xf32>, vector<4x512xf32>, vector<4x512xf32>, vector<4x512xf32> -> vector<36x512xf32>
    %c0_5 = arith.constant 0 : index
    %c0_6 = arith.constant 0 : index
    %46 = vector.load %arg2[%c0_5, %c0_6] : memref<8x36xf32, #tpu.memory_space<vmem>>, vector<8x36xf32>
    %cst = arith.constant dense<0.000000e+00> : vector<8x512xf32>
    %47 = tpu.matmul %46, %45, %cst {dimension_numbers = #tpu.dot_dimension_numbers<[1], [0], [0], [1], [0, 0, 1, 1], [], []>} : vector<8x36xf32>, vector<36x512xf32>, vector<8x512xf32> -> vector<8x512xf32>
    %48 = vector.broadcast %4 : vector<8x1xf32> to vector<8x512xf32>
    %49 = arith.mulf %47, %48 : vector<8x512xf32>
    %50 = vector.broadcast %5 : vector<8x1xf32> to vector<8x512xf32>
    %51 = arith.addf %49, %50 : vector<8x512xf32>
    %cst_7 = arith.constant 0.000000e+00 : f32
    %52 = vector.broadcast %cst_7 : f32 to vector<8x512xf32>
    %53 = arith.maximumf %51, %52 : vector<8x512xf32>
    %c17_i32_8 = arith.constant 17 : i32
    %54 = tpu.dynamic_rotate %53 by %c17_i32_8 dim 1 : vector<8x512xf32>, i32 -> vector<8x512xf32>
    %55 = vector.extract_strided_slice %8 {offsets = [0, 0], sizes = [1, 512], strides = [1, 1]} : vector<9x512xf32> to vector<1x512xf32>
    %56 = vector.broadcast %55 : vector<1x512xf32> to vector<8x512xf32>
    %57 = arith.mulf %54, %56 : vector<8x512xf32>
    %c16_i32_9 = arith.constant 16 : i32
    %58 = tpu.dynamic_rotate %53 by %c16_i32_9 dim 1 : vector<8x512xf32>, i32 -> vector<8x512xf32>
    %59 = vector.extract_strided_slice %8 {offsets = [1, 0], sizes = [1, 512], strides = [1, 1]} : vector<9x512xf32> to vector<1x512xf32>
    %60 = vector.broadcast %59 : vector<1x512xf32> to vector<8x512xf32>
    %61 = arith.mulf %58, %60 : vector<8x512xf32>
    %c15_i32_10 = arith.constant 15 : i32
    %62 = tpu.dynamic_rotate %53 by %c15_i32_10 dim 1 : vector<8x512xf32>, i32 -> vector<8x512xf32>
    %63 = vector.extract_strided_slice %8 {offsets = [2, 0], sizes = [1, 512], strides = [1, 1]} : vector<9x512xf32> to vector<1x512xf32>
    %64 = vector.broadcast %63 : vector<1x512xf32> to vector<8x512xf32>
    %65 = arith.mulf %62, %64 : vector<8x512xf32>
    %c1_i32_11 = arith.constant 1 : i32
    %66 = tpu.dynamic_rotate %53 by %c1_i32_11 dim 1 : vector<8x512xf32>, i32 -> vector<8x512xf32>
    %67 = vector.extract_strided_slice %8 {offsets = [3, 0], sizes = [1, 512], strides = [1, 1]} : vector<9x512xf32> to vector<1x512xf32>
    %68 = vector.broadcast %67 : vector<1x512xf32> to vector<8x512xf32>
    %69 = arith.mulf %66, %68 : vector<8x512xf32>
    %c511_i32_12 = arith.constant 511 : i32
    %70 = tpu.dynamic_rotate %53 by %c511_i32_12 dim 1 : vector<8x512xf32>, i32 -> vector<8x512xf32>
    %71 = vector.extract_strided_slice %8 {offsets = [5, 0], sizes = [1, 512], strides = [1, 1]} : vector<9x512xf32> to vector<1x512xf32>
    %72 = vector.broadcast %71 : vector<1x512xf32> to vector<8x512xf32>
    %73 = arith.mulf %70, %72 : vector<8x512xf32>
    %c497_i32_13 = arith.constant 497 : i32
    %74 = tpu.dynamic_rotate %53 by %c497_i32_13 dim 1 : vector<8x512xf32>, i32 -> vector<8x512xf32>
    %75 = vector.extract_strided_slice %8 {offsets = [6, 0], sizes = [1, 512], strides = [1, 1]} : vector<9x512xf32> to vector<1x512xf32>
    %76 = vector.broadcast %75 : vector<1x512xf32> to vector<8x512xf32>
    %77 = arith.mulf %74, %76 : vector<8x512xf32>
    %c496_i32_14 = arith.constant 496 : i32
    %78 = tpu.dynamic_rotate %53 by %c496_i32_14 dim 1 : vector<8x512xf32>, i32 -> vector<8x512xf32>
    %79 = vector.extract_strided_slice %8 {offsets = [7, 0], sizes = [1, 512], strides = [1, 1]} : vector<9x512xf32> to vector<1x512xf32>
    %80 = vector.broadcast %79 : vector<1x512xf32> to vector<8x512xf32>
    %81 = arith.mulf %78, %80 : vector<8x512xf32>
    %c495_i32_15 = arith.constant 495 : i32
    %82 = tpu.dynamic_rotate %53 by %c495_i32_15 dim 1 : vector<8x512xf32>, i32 -> vector<8x512xf32>
    %83 = vector.extract_strided_slice %8 {offsets = [8, 0], sizes = [1, 512], strides = [1, 1]} : vector<9x512xf32> to vector<1x512xf32>
    %84 = vector.broadcast %83 : vector<1x512xf32> to vector<8x512xf32>
    %85 = arith.mulf %82, %84 : vector<8x512xf32>
    %86 = tpu.concatenate %57, %61, %65, %69, %53, %73, %77, %81, %85 in 0 : vector<8x512xf32>, vector<8x512xf32>, vector<8x512xf32>, vector<8x512xf32>, vector<8x512xf32>, vector<8x512xf32>, vector<8x512xf32>, vector<8x512xf32>, vector<8x512xf32> -> vector<72x512xf32>
    %c0_16 = arith.constant 0 : index
    %c0_17 = arith.constant 0 : index
    %87 = vector.load %arg3[%c0_16, %c0_17] : memref<8x72xf32, #tpu.memory_space<vmem>>, vector<8x72xf32>
    %cst_18 = arith.constant dense<0.000000e+00> : vector<8x512xf32>
    %88 = tpu.matmul %87, %86, %cst_18 {dimension_numbers = #tpu.dot_dimension_numbers<[1], [0], [0], [1], [0, 0, 1, 1], [], []>} : vector<8x72xf32>, vector<72x512xf32>, vector<8x512xf32> -> vector<8x512xf32>
    %89 = vector.broadcast %6 : vector<8x1xf32> to vector<8x512xf32>
    %90 = arith.mulf %88, %89 : vector<8x512xf32>
    %91 = vector.broadcast %7 : vector<8x1xf32> to vector<8x512xf32>
    %92 = arith.addf %90, %91 : vector<8x512xf32>
    %cst_19 = arith.constant 0.000000e+00 : f32
    %93 = vector.broadcast %cst_19 : f32 to vector<4x512xf32>
    %94 = tpu.concatenate %0, %93 in 0 : vector<4x512xf32>, vector<4x512xf32> -> vector<8x512xf32>
    %95 = arith.addf %92, %94 : vector<8x512xf32>
    %c0_20 = arith.constant 0 : index
    %c0_21 = arith.constant 0 : index
    %96 = vector.load %arg6[%c0_20, %c0_21] : memref<8x512xf32, #tpu.memory_space<vmem>>, vector<8x512xf32>
    tpu.vector_store %arg6[%c0_20, %c0_21], %95 {strides = array<i32>} : memref<8x512xf32, #tpu.memory_space<vmem>>, vector<8x512xf32>,
    return
  }
  func.func @transform_0(%arg0: i32) -> (i32, i32) {
    %c0_i32 = arith.constant 0 : i32
    %c0_i32_0 = arith.constant 0 : i32
    return %c0_i32, %arg0 : i32, i32
  }
  func.func @transform_1(%arg0: i32) -> (i32, i32) {
    %c0_i32 = arith.constant 0 : i32
    %c0_i32_0 = arith.constant 0 : i32
    %c0_i32_1 = arith.constant 0 : i32
    return %c0_i32, %c0_i32_0 : i32, i32
  }
  func.func @transform_2(%arg0: i32) -> (i32, i32) {
    %c0_i32 = arith.constant 0 : i32
    %c0_i32_0 = arith.constant 0 : i32
    %c0_i32_1 = arith.constant 0 : i32
    return %c0_i32, %c0_i32_0 : i32, i32
  }
  func.func @transform_3(%arg0: i32) -> (i32, i32) {
    %c0_i32 = arith.constant 0 : i32
    %c0_i32_0 = arith.constant 0 : i32
    %c0_i32_1 = arith.constant 0 : i32
    return %c0_i32, %c0_i32_0 : i32, i32
  }
  func.func @transform_4(%arg0: i32) -> (i32, i32) {
    %c0_i32 = arith.constant 0 : i32
    %c0_i32_0 = arith.constant 0 : i32
    %c0_i32_1 = arith.constant 0 : i32
    return %c0_i32, %c0_i32_0 : i32, i32
  }
  func.func @transform_5(%arg0: i32) -> (i32, i32) {
    %c0_i32 = arith.constant 0 : i32
    %c0_i32_0 = arith.constant 0 : i32
    return %c0_i32, %arg0 : i32, i32
  }
}

</mosaic_0001>

<bundles_post_ra>
// kernel: tpu_custom_call.1
= control target key start
LH: loop header
LB: loop body
LE: loop exit
PB: predicated region body
PF: predicated region fallthrough
CT: control target
= control target key end

     0   :  { %10 = vsyncpa [#allocation3], 0  ;;  %s2515_s0 = inlined_call_operand.hbm [shape: f32[4,1024], index: 0, kind: input, shape index: {}]   ;;  %s2516_s1 = inlined_call_operand.hbm [shape: f32[8,36], index: 1, kind: input, shape index: {}]   ;;  %s2517_s2 = inlined_call_operand.hbm [shape: f32[8,72], index: 2, kind: input, shape index: {}]   ;;  %s2518_s3 = inlined_call_operand.vmem [shape: f32[8,8], index: 3, kind: input, shape index: {}]   ;;  %s2519_s4 = inlined_call_operand.hbm [shape: f32[9,512], index: 4, kind: input, shape index: {}]   ;;  %s2520_s5 = inlined_call_operand.hbm [shape: f32[8,1024], index: 5, kind: output, shape index: {}]  }
   0x1   :  { %12 = vsyncpa [#allocation3 + $0x1], 0 }
   0x2   :  { %13 = vsyncpa [#allocation6], 0 }
   0x3   :  { %14 = vsyncpa [#allocation9], 0 }
   0x4   :  { %15 = vsyncpa [#allocation4], 0 }
   0x5   :  { %17 = vsyncpa [#allocation4 + $0x1], 0  ;;  %s1689_s18 = smov 0   ;;  %s1691_s19 = smov 0  }
   0x6   :  { %s1693_s20 = smov 0   ;;  %s1695_s21 = smov 0  }
   0x7 LB: > { %s1710_s22 = sadd.s32 4294967295, %s1634_s21   ;;  %s1260_s23 = sadd.s32 4294967294, %s1634_s21   ;;  %s1634_s21 = sphi %s1695_s21, %s2563_s21   ;;  %s1630_s20 = sphi %s1693_s20, %s2562_s20   ;;  %s1626_s19 = sphi %s1691_s19, %s2561_s19   ;;  %s1622_s18 = sphi %s1689_s18, %s2560_s18  }
   0x8   : > { %p43_p0 = scmp.ne.s32.totalorder %s1626_s19, %s1622_s18  ;;  %p2521_p1 = scmp.eq.s32.totalorder %s1710_s22, 0 }
   0x9   : > { %p157_p3 = scmp.eq.s32.totalorder %s1260_s23, 1  ;;  %p1261_p5 = scmp.ge.s32.totalorder %s1634_s21, 1 }
   0xa   : > { %p1719_p4 = por %p2521_p1, %p43_p0  ;;  %p164_p7 = scmp.lt.s32.totalorder %s1634_s21, 3 }
   0xb   : > { %p1724_p6 = por %p157_p3, %p43_p0  ;;  %s1636_s27 = smov [#allocation5]  }
   0xc   : > { %s2533_s24 = scalar_select %p1719_p4, 1, 0 }
   0xd   : > { %s2534_s25 = scalar_select %p1724_p6, 1, 0 }
   0xe   : > { %p1729_p8 = pnand %p1261_p5, %p164_p7  ;;  %s177_s28 = sshll.u32 %s1636_s27, 4  ;;  %s178_s28 = int_to_ptr.vmem [resolvable:$true] %s177_s28 }
   0xf   : > { %s1637_s29 = smov [#allocation7]   ;;  %s1638_s7 = smov [#allocation8]  }
  0x10   : > { %s2535_s26 = scalar_select %p1729_p8, 1, 0 }
  0x11   : > { %p1358_p10 = pneg %p1729_p8  ;;  %s188_s30 = sshll.u32 %s1637_s29, 4  ;;  %s1742_s30 = int_to_ptr.vmem [resolvable:$true] %s188_s30 }
  0x12   : > { %s201_s8 = sshll.u32 %s1638_s7, 4  ;;  %s1446_s11 = scalar_lea.hbm %s2516_s1, 128  ;;  %s1744_s8 = int_to_ptr.vmem [resolvable:$true] %s201_s8 }
  0x13   : > { %p1738_p11 = pnand %p1358_p10, %p2521_p1  ;;  %p1447_p12 = scmp.ne.s32.totalorder %s2516_s1, %s1446_s11 }
  0x14   : > { %p1453_p5 = scmp.lt.u32.totalorder %s1446_s11, %s2516_s1 }
  0x15   : > { %p1754_p13 = pneg %p1738_p11 }
  0x17   : > { %p1449_p0 = pnand %p1754_p13, %p1447_p12 }
  0x19   : > { %p1450_p3 = pneg %p1449_p0 }
  0x1b   : > { %p1455_p7 = pnand %p1453_p5, %p1450_p3 }
  0x1d   : > { %1458 = shalt.err (!%p1455_p7)
}
  0x1e   : > { %s1459_s17 = scalar_lea.vmem %s178_s28, 128  ;;  %p1467_p2 = scmp.lt.s32.totalorder %s178_s28, %s178_s28 }
  0x1f   : > { %p1460_p10 = scmp.ne.s32.totalorder %s178_s28, %s1459_s17  ;;  %p1468_p6 = scmp.lt.s32.totalorder %s1459_s17, %s1459_s17 }
  0x21   : > { %p1462_p9 = pnand %p1460_p10, %p1754_p13  ;;  %p1469_p4 = por %p1468_p6, %p1467_p2 }
  0x23   : > { %p1463_p1 = pneg %p1462_p9 }
  0x25   : > { %p1470_p8 = pnand %p1469_p4, %p1463_p1 }
  0x27   : > { %1473 = shalt.err (!%p1470_p8)
}
  0x28   : > { %1361 = dma.hbm_to_vmem [thread:$0]  (!%p1738_p11), %s2516_s1, 128, %s178_s28, [#allocation6]  }
  0x29   : > { %s1474_s9 = scalar_lea.hbm %s2517_s2, 128 }
  0x2a   : > { %p1475_p9 = scmp.ne.s32.totalorder %s2517_s2, %s1474_s9  ;;  %p1481_p1 = scmp.lt.u32.totalorder %s1474_s9, %s2517_s2 }
  0x2c   : > { %p1477_p12 = pnand %p1475_p9, %p1754_p13 }
  0x2e   : > { %p1478_p2 = pneg %p1477_p12 }
  0x30   : > { %p1483_p4 = pnand %p1481_p1, %p1478_p2 }
  0x32   : > { %1486 = shalt.err (!%p1483_p4)
}
  0x33   : > { %s1487_s28 = scalar_lea.vmem %s1742_s30, 128  ;;  %p1495_p3 = scmp.lt.s32.totalorder %s1742_s30, %s1742_s30 }
  0x34   : > { %p1488_p6 = scmp.ne.s32.totalorder %s1742_s30, %s1487_s28  ;;  %p1496_p5 = scmp.lt.s32.totalorder %s1487_s28, %s1487_s28 }
  0x36   : > { %p1490_p8 = pnand %p1488_p6, %p1754_p13  ;;  %p1497_p7 = por %p1496_p5, %p1495_p3 }
  0x38   : > { %p1491_p0 = pneg %p1490_p8 }
  0x3a   : > { %p1498_p10 = pnand %p1497_p7, %p1491_p0 }
  0x3c   : > { %1501 = shalt.err (!%p1498_p10)
}
  0x3d   : > { %1364 = dma.hbm_to_vmem [thread:$0]  (!%p1738_p11), %s2517_s2, 128, %s1742_s30, [#allocation6]  }
  0x3e   : > { %s1502_s27 = scalar_lea.hbm %s2519_s4, 1024 }
  0x3f   : > { %p1503_p9 = scmp.ne.s32.totalorder %s2519_s4, %s1502_s27  ;;  %p1509_p1 = scmp.lt.u32.totalorder %s1502_s27, %s2519_s4 }
  0x41   : > { %p1505_p12 = pnand %p1503_p9, %p1754_p13 }
  0x43   : > { %p1506_p2 = pneg %p1505_p12 }
  0x45   : > { %p1511_p4 = pnand %p1509_p1, %p1506_p2 }
  0x47   : > { %1514 = shalt.err (!%p1511_p4)
}
  0x48   : > { %s1515_s30 = scalar_lea.vmem %s1744_s8, 1024  ;;  %p1523_p3 = scmp.lt.s32.totalorder %s1744_s8, %s1744_s8 }
  0x49   : > { %p1516_p6 = scmp.ne.s32.totalorder %s1744_s8, %s1515_s30  ;;  %p1524_p5 = scmp.lt.s32.totalorder %s1515_s30, %s1515_s30 }
  0x4b   : > { %p1518_p8 = pnand %p1516_p6, %p1754_p13  ;;  %p1525_p7 = por %p1524_p5, %p1523_p3 }
  0x4d   : > { %p1519_p0 = pneg %p1518_p8 }
  0x4f   : > { %p1526_p10 = pnand %p1525_p7, %p1519_p0 }
  0x51   : > { %1529 = shalt.err (!%p1526_p10)
}
  0x52   : > { %s1639_s11 = smov 512   ;;  %s1640_s14 = smov 32  }
  0x53   : > { %1367 = dma.hbm_to_vmem [thread:$0]  (!%p1738_p11), %s2519_s4, 1024, %s1744_s8, [#allocation9], %s1639_s11, %s1639_s11, %s1640_s14  }
  0x54   : > { %s1817_s28 = sadd.s32 1, %s1634_s21   ;;  %s30_s16 = sadd.s32 1, %s1630_s20 }
  0x55   : > { %s27_s15 = ssub.s32 %s1634_s21, %s1817_s28  ;;  %p37_p9 = scmp.ne.s32.totalorder %s1630_s20, %s1626_s19 }
  0x56   : > { %p28_p13 = scmp.eq.s32.totalorder %s27_s15, 0  ;;  %p38_p12 = scmp.eq.s32.totalorder %s1634_s21, 0 }
  0x57   : > { %p1379_p2 = scmp.lt.s32.totalorder %s1634_s21, 2  ;;  %p2538_p4 = scmp.eq.s32.totalorder %s1710_s22, 1 }
  0x58   : > { %s1827_s17 = scalar_select %p28_p13, %s1630_s20, %s30_s16  }
  0x59   : > { %p39_p1 = por %p38_p12, %p37_p9  ;;  %p1831_p6 = por %p2538_p4, %p37_p9 }
  0x5a   : > { %s215_s6 = sand.u32 1, %s1630_s20   ;;  %s1292_s27 = sshll.u32 %s1634_s21, 8 }
  0x5b   : > { %s1266_s8 = sshll.u32 %s215_s6, 4  ;;  %s1840_s9 = scalar_lea.hbm %s2515_s0, %s1292_s27 }
  0x5c   : > { %s219_s10 = scalar_lea.vmem [#allocation2], %s1266_s8  ;;  %p1842_p11 = pnand %p1379_p2, %p39_p1 }
  0x5d   : > { %s227_s30 = sshll.u32 %s219_s10, 4  ;;  %s216_s14 = scalar_lea.sflag [#allocation3], %s215_s6  ;;  %s1846_s30 = int_to_ptr.vmem [resolvable:$true] %s227_s30 }
  0x5e   : > { %s1530_s12 = scalar_lea.hbm %s1840_s9, 256  ;;  %p1532_p0 = pneg %p1842_p11 }
  0x5f   : > { %p1531_p8 = scmp.ne.s32.totalorder %s1840_s9, %s1530_s12  ;;  %s1535_s16 = scalar_lea.hbm %s2515_s0, 512 }
  0x60   : > { %p1536_p7 = scmp.lt.u32.totalorder %s1840_s9, %s2515_s0  ;;  %p1537_p10 = scmp.lt.u32.totalorder %s1535_s16, %s1530_s12 }
  0x61   : > { %p1533_p3 = pnand %p1532_p0, %p1531_p8  ;;  %p1539_p9 = scmp.lt.u32.totalorder %s1530_s12, %s1840_s9 }
  0x62   : > { %p1538_p13 = por %p1537_p10, %p1536_p7 }
  0x63   : > { %p1534_p5 = pneg %p1533_p3 }
  0x64   : > { %p1540_p12 = por %p1539_p9, %p1538_p13 }
  0x66   : > { %p1541_p2 = pnand %p1540_p12, %p1534_p5 }
  0x68   : > { %1544 = shalt.err (!%p1541_p2)
}
  0x69   : > { %s1545_s6 = scalar_lea.vmem %s1846_s30, 256  ;;  %s1641_s29 = smov [#allocation2]  }
  0x6a   : > { %p1546_p1 = scmp.ne.s32.totalorder %s1846_s30, %s1545_s6  ;;  %s1550_s7 = sshll.u32 %s1641_s29, 4  ;;  %s1551_s7 = int_to_ptr.vmem [resolvable:$false] %s1550_s7 }
  0x6b   : > { %s1552_s10 = scalar_lea.vmem %s1551_s7, 512  ;;  %p1553_p3 = scmp.lt.s32.totalorder %s1846_s30, %s1551_s7 }
  0x6c   : > { %p1548_p4 = pnand %p1546_p1, %p1532_p0  ;;  %p1554_p7 = scmp.lt.s32.totalorder %s1552_s10, %s1545_s6 }
  0x6e   : > { %p1549_p8 = pneg %p1548_p4  ;;  %p1555_p10 = por %p1554_p7, %p1553_p3 }
  0x70   : > { %p1556_p13 = pnand %p1555_p10, %p1549_p8 }
  0x72   : > { %1559 = shalt.err (!%p1556_p13)
}
  0x73   : > { %1371 = dma.hbm_to_vmem [thread:$0]  (!%p1842_p11), %s1840_s9, 256, %s1846_s30, %s216_s14  }
  0x74   : > { %p2541_p5 = scmp.ne.s32.totalorder %s2535_s26, 0 }
  0x76   : > { %236 = sbr.rel (%p2541_p5) target bundleno = 1093 (0x445), region = 40 }
  0x7d   : > { %s1876_s12 = sand.u32 1, %s1626_s19   ;;  %p2542_p0 = scmp.ne.s32.totalorder %s2533_s24, 0 }
  0x7e   : > { %s1270_s13 = sshll.u32 %s1876_s12, 4  ;;  %s239_s15 = scalar_lea.sflag [#allocation3], %s1876_s12 }
  0x7f   : > { %s242_s16 = scalar_lea.vmem [#allocation2], %s1270_s13 }
  0x80   : > { %1605 = dma.done.wait (%p2542_p0), %s239_s15, 256  }
  0x81   : > { %1607 = vsyncadd (%p2542_p0), %s239_s15, 4294967040  ;;  %p2543_p9 = scmp.eq.s32.totalorder %s1710_s22, 0 }
  0x83   : > { %1609 = dma.done.wait (%p2543_p9), [#allocation6], 256   ;;  %p2544_p11 = pmov %p2543_p9 }
  0x84   : > { %p2545_p12 = pmov %p2543_p9 }
  0x85   : > { %1611 = vsyncadd (%p2544_p11), [#allocation6], 4294967040 }
  0x86   : > { %1613 = dma.done.wait (%p2545_p12), [#allocation9], 1024   ;;  %p2546_p2 = pmov %p2543_p9 }
  0x87   : > { %v1642_v0 = vmov 0   ;;  %v1895_v1 = vld [vmem:[%s2518_s3] sm:$0xff]  ;;  %v1643_v2 = vmov 1   ;;  %v1644_v3 = vmov 839922192   ;;  %v301_v5 = vlaneseq  ;;  %v1905_v12 = vld [vmem:[%s242_s16 + $0x8] sm:$0xff] }
  0x88   : > { %1615 = vsyncadd (%p2546_p2), [#allocation9], 4294966272  ;;  %1437 = vset.pattern.permute.xlu0 %v1642_v0  ;;  %v299_v4 = vunpack.c.l.s4 %v1644_v3  ;;  %v1903_v11 = vld [vmem:[%s242_s16] sm:$0xff]  ;;  %2548 = vst [vmem:[#allocation16_spill] sm:$0xff] %v1905_v12  ;;  %s1645_s24 = smov 16   ;;  %s1646_s30 = smov 1  }
  0x89   : > { %296 = vperm.xlu0 %1437, %v1895_v1   ;;  %v1900_v7 = vshrl.u32 %v301_v5, 7  ;;  %2547 = vst [vmem:[#allocation15_spill] sm:$0xff] %v1903_v11  ;;  %s1647_s11 = smov 17   ;;  %s1648_s14 = smov 15   ;;  %v2524_v21 = vmov 0.0   ;;  %v1654_v22 = vmov 2  }
  0x8a   : > { %v300_v6 = vunpack.c.0.s8 %v299_v4  ;;  %s1649_s27 = smov 127   ;;  %s1650_s8 = smov 112   ;;  %810 = vmatprep.mubr.f32.mxu1 %v2524_v21  ;;  %739 = vmatprep.mubr.f32.mxu0 %v2524_v21  ;;  %v1655_v23 = vmov 3   ;;  %v2006_v33 = vand.u32 127, %v301_v5  ;;  %v2010_v35 = vld [vmem:[#allocation8 + $0x18] sm:$0xff]  ;;  %v286_v56 = vld [vmem:[#allocation8] sm:$0xff] }
  0x8b   : > { %s1651_s6 = smov 113   ;;  %s1652_s29 = smov 111   ;;  %1439 = vset.pattern.permute.xlu1 %v1654_v22  ;;  %v2013_v36 = vsub.s32 1, %v1900_v7  ;;  %v443_v37 = vsub.s32 3, %v1900_v7  ;;  %v344_v41 = vsub.s32 0, %v1900_v7  ;;  %v410_v46 = vsub.s32 2, %v1900_v7 }
  0x8c   : > { %v303_v8 = vsub.s32 %v300_v6, %v1900_v7  ;;  %vm370_vm0 = vcmp.lt.s32.totalorder %v2006_v33, 16  ;;  %vm436_vm1 = vcmp.lt.s32.totalorder %v2006_v33, 1  ;;  %vm337_vm2 = vcmp.lt.s32.totalorder %v2006_v33, 17  ;;  %v2058_v58 = vld [vmem:[#allocation8 + $0x8] sm:$0xff]  ;;  %v2063_v62 = vld [vmem:[#allocation8 + $0x10] sm:$0xff]  ;;  %s1274_s7 = sshll.u32 %s1876_s12, 5 }
  0x8d   : > { %1438 = vset.pattern.permute.xlu0 %v1643_v2  ;;  %v2021_v39 = vrot.slane %v2010_v35, %v2013_v36  ;;  %v2025_v40 = vrot.slane %v2010_v35, %v443_v37  ;;  %v2039_v45 = vrot.slane %v2010_v35, %v344_v41  ;;  %v2049_v52 = vrot.slane %v2010_v35, %v410_v46  ;;  %s280_s10 = scalar_lea.vmem [#allocation10], %s1274_s7  ;;  %s1293_s13 = sshll.u32 %s1710_s22, 9 }
  0x8e   : > { %309 = vperm.xlu0 %1438, %v1895_v1   ;;  %vm403_vm3 = vcmp.lt.s32.totalorder %v2006_v33, 15  ;;  %vm641_vm4 = vcmask 1043456   ;;  %v476_v63 = vsub.s32 5, %v1900_v7  ;;  %v2071_v4 = vrot.slane %v286_v56, %v2013_v36  ;;  %s1161_s15 = sshll.u32 %s280_s10, 4  ;;  %s2471_s9 = scalar_lea.hbm %s2520_s5, %s1293_s13  ;;  %s2473_s15 = int_to_ptr.vmem [resolvable:$true] %s1161_s15 }
  0x8f   : > { %2549 = vst [vmem:[#allocation17_spill] sm:$0xff] %v2025_v40  ;;  %2550 = vst [vmem:[#allocation18_spill] sm:$0xff] %v2049_v52  ;;  %v2074_v5 = vrot.slane %v2058_v58, %v443_v37  ;;  %v2076_v6 = vrot.slane %v286_v56, %v443_v37  ;;  %v2093_v22 = vrot.slane %v2058_v58, %v410_v46  ;;  %vm469_vm5 = vcmp.lt.s32.totalorder %v2006_v33, 127  ;;  %s1658_s22 = smov [#allocation10]  }
  0x90   : > { %vm535_vm6 = vcmp.lt.s32.totalorder %v2006_v33, 112  ;;  %vm502_vm7 = vcmp.lt.s32.totalorder %v2006_v33, 113  ;;  %vm568_vm8 = vcmp.lt.s32.totalorder %v2006_v33, 111  ;;  %vm659_vm9 = vcmask 293888  }
  0x91   : > { %2551 = vst [vmem:[#allocation19_spill] sm:$0xff] %v2076_v6  ;;  %vm966_vm10 = vcmask 588800  }
  0x92   : > { %1440 = vset.pattern.permute.xlu0 %v1655_v23  ;;  %v2095_v23 = vrot.slane %v286_v56, %v410_v46 }
 0x108   : > { %v297_v9 = vpop.permute.xlu0 %296 }
 0x109   : > { %v304_v10 = vrot.slane %v297_v9, %v303_v8  ;;  %v2079_v9 = vrot.slane %v2063_v62, %v443_v37  ;;  %v542_v37 = vsub.s32 7, %v1900_v7 }
 0x10b   : > { %v306_v14 = vmul.f32 %v304_v10, %v1903_v11  ;;  %v307_v15 = vmul.f32 %v304_v10, %v1905_v12  ;;  %v2082_v10 = vrot.slane %v2058_v58, %v344_v41 }
 0x10d   : > { %v310_v13 = vpop.permute.xlu0 %309 }
 0x10e   : > { %v317_v16 = vrot.slane %v310_v13, %v303_v8  ;;  %v2084_v13 = vrot.slane %v286_v56, %v344_v41 }
 0x110   : > { %v1909_v17 = vadd.f32 %v317_v16, %v306_v14  ;;  %v1911_v18 = vadd.f32 %v317_v16, %v307_v15  ;;  %v2087_v14 = vrot.slane %v2063_v62, %v344_v41  ;;  %v2102_v41 = vrot.slane %v286_v56, %v476_v63 }
 0x112   : > { %362 = vrot.lane.b32.xlu1 %v1909_v17, %s1645_s24  ;;  %v1917_v19 = vcombine.high %v1911_v18, %v1911_v18  ;;  %v1925_v20 = vcombine.high %v1909_v17, %v1909_v17 }
 0x114   : > { %368 = vrot.lane.b32.xlu0 %v1917_v19, %s1645_s24 }
 0x116   : > { %366 = vrot.lane.b32.xlu1 %v1911_v18, %s1645_s24 }
 0x118   : > { %430 = vrot.lane.b32.xlu0 %v1925_v20, %s1646_s30 }
 0x11a   : > { %428 = vrot.lane.b32.xlu1 %v1909_v17, %s1646_s30 }
 0x11c   : > { %434 = vrot.lane.b32.xlu0 %v1917_v19, %s1646_s30 }
 0x11e   : > { %432 = vrot.lane.b32.xlu1 %v1911_v18, %s1646_s30 }
 0x120   : > { %329 = vrot.lane.b32.xlu0 %v1925_v20, %s1647_s11 }
 0x122   : > { %327 = vrot.lane.b32.xlu1 %v1909_v17, %s1647_s11 }
 0x124   : > { %333 = vrot.lane.b32.xlu0 %v1917_v19, %s1647_s11 }
 0x126   : > { %331 = vrot.lane.b32.xlu1 %v1911_v18, %s1647_s11 }
 0x128   : > { %397 = vrot.lane.b32.xlu0 %v1925_v20, %s1648_s14 }
 0x12a   : > { %395 = vrot.lane.b32.xlu1 %v1909_v17, %s1648_s14 }
 0x12c   : > { %401 = vrot.lane.b32.xlu0 %v1917_v19, %s1648_s14 }
 0x12e   : > { %399 = vrot.lane.b32.xlu1 %v1911_v18, %s1648_s14 }
 0x130   : > { %463 = vrot.lane.b32.xlu0 %v1925_v20, %s1649_s27 }
 0x132   : > { %461 = vrot.lane.b32.xlu1 %v1909_v17, %s1649_s27 }
 0x134   : > { %467 = vrot.lane.b32.xlu0 %v1917_v19, %s1649_s27 }
 0x136   : > { %465 = vrot.lane.b32.xlu1 %v1911_v18, %s1649_s27 }
 0x138   : > { %529 = vrot.lane.b32.xlu0 %v1925_v20, %s1650_s8 }
 0x13a   : > { %527 = vrot.lane.b32.xlu1 %v1909_v17, %s1650_s8 }
 0x13c   : > { %533 = vrot.lane.b32.xlu0 %v1917_v19, %s1650_s8 }
 0x13e   : > { %531 = vrot.lane.b32.xlu1 %v1911_v18, %s1650_s8 }
 0x140   : > { %496 = vrot.lane.b32.xlu0 %v1925_v20, %s1651_s6 }
 0x142   : > { %364 = vrot.lane.b32.xlu1 %v1925_v20, %s1645_s24 }
 0x144   : > { %500 = vrot.lane.b32.xlu0 %v1917_v19, %s1651_s6 }
 0x146   : > { %494 = vrot.lane.b32.xlu1 %v1909_v17, %s1651_s6 }
 0x148   : > { %562 = vrot.lane.b32.xlu0 %v1925_v20, %s1652_s29 }
 0x14a   : > { %498 = vrot.lane.b32.xlu1 %v1911_v18, %s1651_s6 }
 0x14c   : > { %566 = vrot.lane.b32.xlu0 %v1917_v19, %s1652_s29 }
 0x14e   : > { %560 = vrot.lane.b32.xlu1 %v1909_v17, %s1652_s29 }
 0x150   : > { %826 = vperm.xlu0 %1440, %v1895_v1  }
 0x152   : > { %564 = vrot.lane.b32.xlu1 %v1911_v18, %s1652_s29 }
 0x156   : > { %818 = vperm.xlu1 %1439, %v1895_v1  }
 0x184   : > { %v1989_v24 = vpop.permute.xlu1 %362 }
 0x186   : > { %v1991_v25 = vpop.permute.xlu0 %368 }
 0x188   : > { %v1993_v26 = vpop.permute.xlu1 %366 }
 0x189   : > { %v371_v43 = vsel %vm370_vm0, %v1993_v26, %v1991_v25 }
 0x18a   : > { %v1995_v27 = vpop.permute.xlu0 %430  ;;  %v394_v49 = vmul.f32 %v2021_v39, %v371_v43  ;;  %v2099_v43 = vrot.slane %v2063_v62, %v410_v46  ;;  %v374_v46 = vsel %vm370_vm0, %v1991_v25, %v1989_v24  ;;  %v2133_v25 = vrot.slane %v2010_v35, %v542_v37 }
 0x18c   : > { %v1997_v28 = vpop.permute.xlu1 %428  ;;  %v600_v57 = vrot.slane %v394_v49, 4  ;;  %v2111_v49 = vrot.slane %v2063_v62, %v476_v63 }
 0x18e   : > { %v435_v29 = vpop.permute.xlu0 %434 }
 0x18f   : > { %v440_v16 = vsel %vm436_vm1, %v435_v29, %v1997_v28 }
 0x190   : > { %v1999_v30 = vpop.permute.xlu1 %432 }
 0x191   : > { %v437_v44 = vsel %vm436_vm1, %v1999_v30, %v435_v29  ;;  %v2108_v29 = vrot.slane %v2058_v58, %v476_v63 }
 0x192   : > { %v2001_v31 = vpop.permute.xlu0 %329  ;;  %v460_v50 = vmul.f32 %v2025_v40, %v437_v44  ;;  %v2105_v44 = vrot.slane %v2010_v35, %v476_v63  ;;  %v2136_v63 = vrot.slane %v2058_v58, %v542_v37 }
 0x194   : > { %v2003_v32 = vpop.permute.xlu1 %327  ;;  %v612_v59 = vrot.slane %v460_v50, 4  ;;  %v509_v50 = vsub.s32 6, %v1900_v7  ;;  %v438_v7 = vsel %vm436_vm1, %v1995_v27, %v1999_v30  ;;  %v2150_v30 = vrot.slane %v2058_v58, %v2013_v36 }
 0x196   : > { %v2008_v34 = vpop.permute.xlu0 %333 }
 0x198   : > { %v2016_v38 = vpop.permute.xlu1 %331 }
 0x199   : > { %v338_v48 = vsel %vm337_vm2, %v2016_v38, %v2008_v34 }
 0x19a   : > { %v2028_v42 = vpop.permute.xlu0 %397  ;;  %v361_v53 = vmul.f32 %v2039_v45, %v338_v48 }
 0x19c   : > { %v396_v47 = vpop.permute.xlu1 %395  ;;  %v645_v2 = vsel %vm641_vm4, %v361_v53, %v600_v57  ;;  %v439_v53 = vsel %vm436_vm1, %v1997_v28, %v1995_v27  ;;  %v341_v28 = vsel %vm337_vm2, %v2008_v34, %v2003_v32  ;;  %v2146_v27 = vrot.slane %v2063_v62, %v542_v37 }
 0x19d   : > { %v2157_v34 = vrot.slane %v2063_v62, %v2013_v36 }
 0x19e   : > { %v402_v51 = vpop.permute.xlu0 %401 }
 0x19f   : > { %v407_v57 = vsel %vm403_vm3, %v402_v51, %v396_v47 }
 0x1a0   : > { %v2053_v54 = vpop.permute.xlu1 %399 }
 0x1a1   : > { %v404_v55 = vsel %vm403_vm3, %v2053_v54, %v402_v51  ;;  %v406_v51 = vsel %vm403_vm3, %v396_v47, %v2028_v42  ;;  %v459_v47 = vmul.f32 %v2079_v9, %v438_v7  ;;  %v405_v36 = vsel %vm403_vm3, %v2028_v42, %v2053_v54 }
 0x1a2   : > { %v427_v60 = vmul.f32 %v2049_v52, %v404_v55  ;;  %v2061_v61 = vpop.permute.xlu0 %463  ;;  %v457_v55 = vmul.f32 %v2076_v6, %v440_v16  ;;  %v424_v16 = vmul.f32 %v2095_v23, %v407_v57  ;;  %v425_v57 = vmul.f32 %v2093_v22, %v406_v51 }
 0x1a3   : > { %v2187_v42 = vrot.slane %v2063_v62, %v509_v50  ;;  %v611_v40 = vrot.slane %v459_v47, 4 }
 0x1a4   : > { %v2066_v0 = vpop.permute.xlu1 %461  ;;  %v649_v3 = vsel %vm641_vm4, %v427_v60, %v612_v59  ;;  %v2130_v60 = vrot.slane %v286_v56, %v542_v37  ;;  %v609_v21 = vrot.slane %v457_v55, 4  ;;  %v2161_v37 = vrot.slane %v286_v56, %v509_v50 }
 0x1a5   : > { %v1302_v8 = vpack.c.bf16 %v649_v3, %v645_v2  ;;  %v391_v3 = vmul.f32 %v2071_v4, %v374_v46  ;;  %v340_v46 = vsel %vm337_vm2, %v2003_v32, %v2001_v31  ;;  %v339_v56 = vsel %vm337_vm2, %v2001_v31, %v2016_v38 }
 0x1a6   : > { %v468_v15 = vpop.permute.xlu0 %467  ;;  %v2181_v32 = vrot.slane %v2010_v35, %v509_v50  ;;  %v646_v54 = vsel %vm641_vm4, %v424_v16, %v609_v21  ;;  %v359_v31 = vmul.f32 %v2082_v10, %v340_v46  ;;  %v426_v38 = vmul.f32 %v2099_v43, %v405_v36 }
 0x1a7   : > { %1303 = vmatprep.subr.bf16.mxu1 %v1302_v8  ;;  %v458_v8 = vmul.f32 %v2074_v5, %v439_v53  ;;  %v358_v53 = vmul.f32 %v2084_v13, %v341_v28  ;;  %v473_v55 = vsel %vm469_vm5, %v468_v15, %v2066_v0  ;;  %v2184_v28 = vrot.slane %v2058_v58, %v509_v50 }
 0x1a8   : > { %v466_v48 = vpop.permute.xlu1 %465  ;;  %v597_v51 = vrot.slane %v391_v3, 4  ;;  %v360_v52 = vmul.f32 %v2087_v14, %v339_v56  ;;  %v493_v58 = vmul.f32 %v2105_v44, %v473_v55  ;;  %v472_v21 = vsel %vm469_vm5, %v2066_v0, %v2061_v61 }
 0x1a9   : > { %v610_v11 = vrot.slane %v458_v8, 4  ;;  %v470_v50 = vsel %vm469_vm5, %v466_v48, %v468_v15  ;;  %v471_v8 = vsel %vm469_vm5, %v2061_v61, %v466_v48 }
 0x1aa   : > { %v530_v59 = vpop.permute.xlu0 %529  ;;  %v642_v62 = vsel %vm641_vm4, %v358_v53, %v597_v51  ;;  %v624_v36 = vrot.slane %v493_v58, 4  ;;  %v492_v56 = vmul.f32 %v2111_v49, %v470_v50 }
 0x1ab   : > { %v647_v3 = vsel %vm641_vm4, %v425_v57, %v610_v11  ;;  %v1296_v47 = vpack.c.bf16 %v646_v54, %v642_v62 }
 0x1ac   : > { %v528_v2 = vpop.permute.xlu1 %527 }
 0x1ad   : > { %v538_v46 = vsel %vm535_vm6, %v528_v2, %v530_v59 }
 0x1ae   : > { %v534_v12 = vpop.permute.xlu0 %533 }
 0x1af   : > { %v539_v6 = vsel %vm535_vm6, %v534_v12, %v528_v2  ;;  %v648_v2 = vsel %vm641_vm4, %v426_v38, %v611_v40 }
 0x1b0   : > { %v532_v7 = vpop.permute.xlu1 %531  ;;  %v559_v11 = vmul.f32 %v2133_v25, %v539_v6  ;;  %v490_v6 = vmul.f32 %v2102_v41, %v472_v21 }
 0x1b1   : > { %v537_v15 = vsel %vm535_vm6, %v530_v59, %v532_v7  ;;  %v556_v59 = vmul.f32 %v2130_v60, %v538_v46 }
 0x1b2   : > { %v497_v35 = vpop.permute.xlu0 %496  ;;  %v636_v62 = vrot.slane %v559_v11, 4  ;;  %v557_v40 = vmul.f32 %v2136_v63, %v537_v15  ;;  %v623_v15 = vrot.slane %v492_v56, 4 }
 0x1b4   : > { %v365_v16 = vpop.permute.xlu1 %364 }
 0x1b5   : > { %v372_v53 = vsel %vm370_vm0, %v365_v16, %v1993_v26  ;;  %v373_v0 = vsel %vm370_vm0, %v1989_v24, %v365_v16  ;;  %v491_v26 = vmul.f32 %v2108_v29, %v471_v8  ;;  %v536_v24 = vsel %vm535_vm6, %v532_v7, %v534_v12 }
 0x1b6   : > { %v392_v61 = vmul.f32 %v2150_v30, %v373_v0  ;;  %v393_v48 = vmul.f32 %v2157_v34, %v372_v53  ;;  %v501_v57 = vpop.permute.xlu0 %500  ;;  %v558_v21 = vmul.f32 %v2146_v27, %v536_v24  ;;  %v621_v16 = vrot.slane %v490_v6, 4 }
 0x1b7   : > { %v622_v0 = vrot.slane %v491_v26, 4 }
 0x1b8   : > { %v598_v55 = vrot.slane %v392_v61, 4  ;;  %v599_v51 = vrot.slane %v393_v48, 4  ;;  %v495_v54 = vpop.permute.xlu1 %494  ;;  %v653_v48 = vsel %vm641_vm4, %v1917_v19, %v624_v36  ;;  %v2247_v19 = vld [vmem:[#allocation8 + $0x38] ss:$0 sm:$0xff] }
 0x1b9   : > { %v505_v38 = vsel %vm502_vm7, %v495_v54, %v497_v35  ;;  %v506_v58 = vsel %vm502_vm7, %v501_v57, %v495_v54  ;;  %v633_v54 = vrot.slane %v556_v59, 4 }
 0x1ba   : > { %v526_v12 = vmul.f32 %v2181_v32, %v506_v58  ;;  %v563_v7 = vpop.permute.xlu0 %562  ;;  %v643_v50 = vsel %vm641_vm4, %v359_v31, %v598_v55  ;;  %v644_v8 = vsel %vm641_vm4, %v360_v52, %v599_v51  ;;  %v523_v46 = vmul.f32 %v2161_v37, %v505_v38 }
 0x1bb   : > { %v1294_v11 = vpack.c.bf16 %v647_v3, %v643_v50  ;;  %v1304_v53 = vpack.c.bf16 %v648_v2, %v644_v8  ;;  %v634_v3 = vrot.slane %v557_v40, 4  ;;  %v635_v2 = vrot.slane %v558_v21, 4  ;;  %v2263_v50 = vld [vmem:[#allocation8 + $0x30] ss:$0 sm:$0xff] }
 0x1bc   : > { %v499_v61 = vpop.permute.xlu1 %498  ;;  %v657_v24 = vsel %vm641_vm4, %v526_v12, %v636_v62  ;;  %v654_v36 = vsel %vm641_vm4, %v523_v46, %v633_v54  ;;  %v652_v55 = vsel %vm641_vm4, %v1911_v18, %v623_v15  ;;  %v650_v38 = vsel %vm641_vm4, %v1909_v17, %v621_v16  ;;  %v2265_v18 = vld [vmem:[#allocation8 + $0x20] ss:$0 sm:$0xff] }
 0x1bd   : > { %v503_v58 = vsel %vm502_vm7, %v499_v61, %v501_v57  ;;  %v504_v52 = vsel %vm502_vm7, %v497_v35, %v499_v61  ;;  %1295 = vmatprep.subr.bf16.mxu0 %v1294_v11  ;;  %1305 = vmatpush1.bf16.msra.mxu1 %v1304_v53  ;;  %v1306_v31 = vpack.c.bf16 %v657_v24, %v653_v48  ;;  %v2552_v61 = vmov 0.0  }
 0x1be   : > { %v524_v6 = vmul.f32 %v2184_v28, %v504_v52  ;;  %v525_v26 = vmul.f32 %v2187_v42, %v503_v58  ;;  %1297 = vmatpush1.bf16.msra.mxu0 %v1296_v47  ;;  %v567_v56 = vpop.permute.xlu0 %566  ;;  %v651_v35 = vsel %vm641_vm4, %v1925_v20, %v622_v0  ;;  %v1300_v12 = vpack.c.bf16 %v654_v36, %v650_v38  ;;  %v2261_v20 = vld [vmem:[#allocation8 + $0x28] ss:$0 sm:$0xff]  ;;  %v658_v0 = vld [vmem:[#allocation5] sm:$0xff] }
 0x1bf   : > { %1307 = vmatprep.subr.bf16.mxu1 %v1306_v31 }
 0x1c0   : > { %v561_v57 = vpop.permute.xlu1 %560  ;;  %v655_v59 = vsel %vm641_vm4, %v524_v6, %v634_v3  ;;  %v656_v51 = vsel %vm641_vm4, %v525_v26, %v635_v2 }
 0x1c1   : > { %v572_v47 = vsel %vm568_vm8, %v567_v56, %v561_v57  ;;  %v1298_v62 = vpack.c.bf16 %v655_v59, %v651_v35  ;;  %v1308_v40 = vpack.c.bf16 %v656_v51, %v652_v55  ;;  %v571_v8 = vsel %vm568_vm8, %v561_v57, %v563_v7 }
 0x1c2   : > { %v592_v21 = vmul.f32 %v2247_v19, %v572_v47  ;;  %v589_v15 = vmul.f32 %v2265_v18, %v571_v8  ;;  %v1656_v47 = vmov 4  }
 0x1c3   : > { %1299 = vmatprep.subr.bf16.mxu0 %v1298_v62  ;;  %1309 = vmatpush1.bf16.msra.mxu1 %v1308_v40  ;;  %v1657_v62 = vmov 5  }
 0x1c4   : > { %1301 = vmatpush1.bf16.msra.mxu0 %v1300_v12  ;;  %1282 = vmatprep.subr.msk.mxu1 %vm641_vm4, %v592_v21  ;;  %v565_v46 = vpop.permute.xlu1 %564 }
 0x1c5   : > { %v569_v17 = vsel %vm568_vm8, %v565_v46, %v567_v56  ;;  %v570_v16 = vsel %vm568_vm8, %v563_v7, %v565_v46  ;;  %1441 = vset.pattern.permute.xlu0 %v1656_v47  ;;  %1442 = vset.pattern.permute.xlu1 %v1657_v62 }
 0x1c6   : > { %v590_v11 = vmul.f32 %v2261_v20, %v570_v16  ;;  %v591_v53 = vmul.f32 %v2263_v50, %v569_v17 }
 0x1c8   : > { %1279 = vmatprep.subr.msk.mxu0 %vm641_vm4, %v590_v11  ;;  %1283 = vmatpush1.msk.msra.mxu1 %vm641_vm4, %v591_v53 }
 0x1c9   : > { %1280 = vmatpush1.msk.msra.mxu0 %vm641_vm4, %v589_v15  ;;  %1284 = vmatmul.mubr.msk.f32.vlgmr.msra.gmra.mrb[0].mxu1 %vm659_vm9, %v658_v0 }
 0x1ca   : > { %1281 = vmatmul.mubr.msk.f32.vlgmr.msra.gmra.mrb[0].mxu0 %vm659_vm9, %v658_v0  ;;  %1105 = vmatprep.mubr.f32.mxu1 %v2552_v61 }
 0x1cb   : > { %1034 = vmatprep.mubr.f32.mxu0 %v2552_v61 }
 0x1cf   : > { %v827_v24 = vpop.permute.xlu0 %826 }
 0x1d5   : > { %v819_v7 = vpop.permute.xlu1 %818 }
 0x29c   : > { %v812_v48 = vpop.f32.mrb[0].mxu1 }
 0x29d   : > { %v823_v54 = vmul.f32 %v819_v7, %v812_v48  ;;  %v741_v58 = vpop.f32.mrb[0].mxu0  ;;  %v814_v52 = vpop.f32.mrb[1].mxu1 }
 0x29e   : > { %v821_v31 = vmul.f32 %v819_v7, %v741_v58  ;;  %v743_v3 = vpop.f32.mrb[1].mxu0  ;;  %v824_v56 = vmul.f32 %v819_v7, %v814_v52 }
 0x29f   : > { %v831_v2 = vadd.f32 %v827_v24, %v823_v54  ;;  %v822_v6 = vmul.f32 %v819_v7, %v743_v3 }
 0x2a0   : > { %v829_v26 = vadd.f32 %v827_v24, %v821_v31  ;;  %v832_v59 = vadd.f32 %v827_v24, %v824_v56 }
 0x2a1   : > { %v2282_v36 = vmax.f32 %v831_v2, 0.0  ;;  %v830_v35 = vadd.f32 %v827_v24, %v822_v6 }
 0x2a2   : > { %v2284_v57 = vmax.f32 %v829_v26, 0.0  ;;  %v2296_v51 = vmax.f32 %v832_v59, 0.0 }
 0x2a3   : > { %841 = vrot.lane.b32.xlu0 %v2282_v36, %s1647_s11  ;;  %v2290_v55 = vmax.f32 %v830_v35, 0.0 }
 0x2a4   : > { %837 = vrot.lane.b32.xlu1 %v2284_v57, %s1647_s11 }
 0x2a7   : > { %853 = vrot.lane.b32.xlu0 %v2284_v57, %s1645_s24 }
 0x2a8   : > { %839 = vrot.lane.b32.xlu1 %v2290_v55, %s1647_s11 }
 0x2ab   : > { %857 = vrot.lane.b32.xlu0 %v2282_v36, %s1645_s24 }
 0x2ac   : > { %843 = vrot.lane.b32.xlu1 %v2296_v51, %s1647_s11  ;;  %s1564_s11 = sshll.u32 %s1658_s22, 4  ;;  %s1565_s11 = int_to_ptr.vmem [resolvable:$false] %s1564_s11 }
 0x2ad   : > { %p1567_p3 = scmp.lt.s32.totalorder %s2473_s15, %s1565_s11 }
 0x2af   : > { %869 = vrot.lane.b32.xlu0 %v2284_v57, %s1648_s14 }
 0x2b0   : > { %855 = vrot.lane.b32.xlu1 %v2290_v55, %s1645_s24 }
 0x2b3   : > { %873 = vrot.lane.b32.xlu0 %v2282_v36, %s1648_s14 }
 0x2b4   : > { %859 = vrot.lane.b32.xlu1 %v2296_v51, %s1645_s24  ;;  %s1147_s24 = scalar_lea.sflag [#allocation4], %s1876_s12 }
 0x2b7   : > { %885 = vrot.lane.b32.xlu0 %v2284_v57, %s1646_s30 }
 0x2b8   : > { %871 = vrot.lane.b32.xlu1 %v2290_v55, %s1648_s14 }
 0x2bb   : > { %889 = vrot.lane.b32.xlu0 %v2282_v36, %s1646_s30 }
 0x2bc   : > { %875 = vrot.lane.b32.xlu1 %v2296_v51, %s1648_s14  ;;  %s1566_s14 = scalar_lea.vmem %s1565_s11, 1024 }
 0x2bf   : > { %901 = vrot.lane.b32.xlu0 %v2284_v57, %s1649_s27 }
 0x2c0   : > { %887 = vrot.lane.b32.xlu1 %v2290_v55, %s1646_s30 }
 0x2c3   : > { %905 = vrot.lane.b32.xlu0 %v2282_v36, %s1649_s27 }
 0x2c4   : > { %891 = vrot.lane.b32.xlu1 %v2296_v51, %s1646_s30  ;;  %s1560_s30 = scalar_lea.vmem %s2473_s15, 512 }
 0x2c5   : > { %p1561_p1 = scmp.ne.s32.totalorder %s2473_s15, %s1560_s30  ;;  %p1568_p7 = scmp.lt.s32.totalorder %s1566_s14, %s1560_s30 }
 0x2c7   : > { %917 = vrot.lane.b32.xlu0 %v2284_v57, %s1651_s6  ;;  %p1562_p4 = pnand %p1561_p1, %p1831_p6  ;;  %p1569_p10 = por %p1568_p7, %p1567_p3 }
 0x2c8   : > { %903 = vrot.lane.b32.xlu1 %v2290_v55, %s1649_s27 }
 0x2c9   : > { %p1563_p8 = pneg %p1562_p4 }
 0x2cb   : > { %921 = vrot.lane.b32.xlu0 %v2282_v36, %s1651_s6  ;;  %p1570_p13 = pnand %p1569_p10, %p1563_p8 }
 0x2cc   : > { %907 = vrot.lane.b32.xlu1 %v2296_v51, %s1649_s27 }
 0x2cf   : > { %933 = vrot.lane.b32.xlu0 %v2284_v57, %s1650_s8 }
 0x2d0   : > { %919 = vrot.lane.b32.xlu1 %v2290_v55, %s1651_s6 }
 0x2d3   : > { %937 = vrot.lane.b32.xlu0 %v2282_v36, %s1650_s8 }
 0x2d4   : > { %923 = vrot.lane.b32.xlu1 %v2296_v51, %s1651_s6 }
 0x2d7   : > { %949 = vrot.lane.b32.xlu0 %v2284_v57, %s1652_s29 }
 0x2d8   : > { %935 = vrot.lane.b32.xlu1 %v2290_v55, %s1650_s8 }
 0x2db   : > { %953 = vrot.lane.b32.xlu0 %v2282_v36, %s1652_s29 }
 0x2dc   : > { %939 = vrot.lane.b32.xlu1 %v2296_v51, %s1650_s8 }
 0x2df   : > { %1113 = vperm.xlu0 %1441, %v1895_v1  }
 0x2e0   : > { %951 = vrot.lane.b32.xlu1 %v2290_v55, %s1652_s29 }
 0x2e3   : > { %1443 = vset.pattern.permute.xlu0 %v1657_v62 }
 0x2e4   : > { %955 = vrot.lane.b32.xlu1 %v2296_v51, %s1652_s29 }
 0x2e8   : > { %1121 = vperm.xlu1 %1442, %v1895_v1  }
 0x315   : > { %v842_v40 = vpop.permute.xlu0 %841 }
 0x316   : > { %v838_v38 = vpop.permute.xlu1 %837 }
 0x319   : > { %v854_v21 = vpop.permute.xlu0 %853 }
 0x31a   : > { %v840_v12 = vpop.permute.xlu1 %839 }
 0x31b   : > { %v847_v17 = vsel %vm337_vm2, %v838_v38, %v840_v12  ;;  %v846_v24 = vsel %vm337_vm2, %v840_v12, %v842_v40 }
 0x31c   : > { %v850_v0 = vmul.f32 %v847_v17, %v2082_v10  ;;  %v851_v26 = vmul.f32 %v846_v24, %v2087_v14  ;;  %v2555_v24 = vld [vmem:[#allocation17_spill] sm:$0xff] }
 0x31d   : > { %v858_v8 = vpop.permute.xlu0 %857 }
 0x31e   : > { %v844_v46 = vpop.permute.xlu1 %843 }
 0x31f   : > { %v845_v61 = vsel %vm337_vm2, %v842_v40, %v844_v46  ;;  %v848_v7 = vsel %vm337_vm2, %v844_v46, %v838_v38 }
 0x320   : > { %v849_v31 = vmul.f32 %v848_v7, %v2084_v13  ;;  %v852_v3 = vmul.f32 %v845_v61, %v2039_v45  ;;  %v2554_v7 = vld [vmem:[#allocation19_spill] sm:$0xff] }
 0x321   : > { %v870_v16 = vpop.permute.xlu0 %869 }
 0x322   : > { %v856_v11 = vpop.permute.xlu1 %855 }
 0x323   : > { %v863_v53 = vsel %vm370_vm0, %v854_v21, %v856_v11  ;;  %v862_v15 = vsel %vm370_vm0, %v856_v11, %v858_v8 }
 0x324   : > { %v866_v1 = vmul.f32 %v863_v53, %v2150_v30  ;;  %v867_v52 = vmul.f32 %v862_v15, %v2157_v34 }
 0x325   : > { %v874_v48 = vpop.permute.xlu0 %873 }
 0x326   : > { %v860_v54 = vpop.permute.xlu1 %859  ;;  %v1310_v58 = vpack.c.bf16 %v866_v1, %v850_v0  ;;  %v1328_v47 = vpack.c.bf16 %v867_v52, %v851_v26  ;;  %v2553_v1 = vld [vmem:[#allocation18_spill] sm:$0xff] }
 0x327   : > { %v861_v10 = vsel %vm370_vm0, %v858_v8, %v860_v54  ;;  %v864_v30 = vsel %vm370_vm0, %v860_v54, %v854_v21 }
 0x328   : > { %v865_v2 = vmul.f32 %v864_v30, %v2071_v4  ;;  %v868_v6 = vmul.f32 %v861_v10, %v2021_v39  ;;  %1311 = vmatprep.subr.bf16.mxu0 %v1310_v58 }
 0x329   : > { %v886_v56 = vpop.permute.xlu0 %885 }
 0x32a   : > { %v1312_v35 = vpack.c.bf16 %v865_v2, %v849_v31  ;;  %v872_v34 = vpop.permute.xlu1 %871  ;;  %v1326_v59 = vpack.c.bf16 %v868_v6, %v852_v3 }
 0x32b   : > { %v879_v45 = vsel %vm403_vm3, %v870_v16, %v872_v34  ;;  %v878_v17 = vsel %vm403_vm3, %v872_v34, %v874_v48 }
 0x32c   : > { %1313 = vmatpush1.bf16.msra.mxu0 %v1312_v35  ;;  %1327 = vmatprep.subr.bf16.mxu1 %v1326_v59  ;;  %v882_v14 = vmul.f32 %v879_v45, %v2093_v22 }
 0x32d   : > { %v890_v62 = vpop.permute.xlu0 %889  ;;  %1329 = vmatpush1.bf16.msra.mxu1 %v1328_v47 }
 0x32e   : > { %v876_v40 = vpop.permute.xlu1 %875 }
 0x32f   : > { %v877_v12 = vsel %vm403_vm3, %v874_v48, %v876_v40  ;;  %v880_v8 = vsel %vm403_vm3, %v876_v40, %v870_v16  ;;  %v883_v48 = vmul.f32 %v878_v17, %v2099_v43 }
 0x330   : > { %v881_v15 = vmul.f32 %v880_v8, %v2095_v23  ;;  %v884_v61 = vmul.f32 %v877_v12, %v2553_v1 }
 0x331   : > { %v902_v13 = vpop.permute.xlu0 %901 }
 0x332   : > { %v888_v4 = vpop.permute.xlu1 %887 }
 0x333   : > { %v895_v39 = vsel %vm436_vm1, %v886_v56, %v888_v4  ;;  %v894_v38 = vsel %vm436_vm1, %v888_v4, %v890_v62 }
 0x334   : > { %v898_v21 = vmul.f32 %v895_v39, %v2074_v5  ;;  %v899_v0 = vmul.f32 %v894_v38, %v2079_v9 }
 0x335   : > { %v906_v46 = vpop.permute.xlu0 %905 }
 0x336   : > { %v892_v11 = vpop.permute.xlu1 %891  ;;  %v1314_v53 = vpack.c.bf16 %v898_v21, %v882_v14  ;;  %v1332_v30 = vpack.c.bf16 %v899_v0, %v883_v48 }
 0x337   : > { %v893_v22 = vsel %vm436_vm1, %v890_v62, %v892_v11  ;;  %v896_v5 = vsel %vm436_vm1, %v892_v11, %v886_v56 }
 0x338   : > { %v897_v16 = vmul.f32 %v896_v5, %v2554_v7  ;;  %v900_v54 = vmul.f32 %v893_v22, %v2555_v24  ;;  %1315 = vmatprep.subr.bf16.mxu0 %v1314_v53 }
 0x339   : > { %v918_v58 = vpop.permute.xlu0 %917 }
 0x33a   : > { %v1316_v52 = vpack.c.bf16 %v897_v16, %v881_v15  ;;  %v904_v9 = vpop.permute.xlu1 %903  ;;  %v1330_v10 = vpack.c.bf16 %v900_v54, %v884_v61  ;;  %v2556_v54 = vld [vmem:[#allocation15_spill] sm:$0xff] }
 0x33b   : > { %v910_v31 = vsel %vm469_vm5, %v904_v9, %v906_v46  ;;  %v911_v23 = vsel %vm469_vm5, %v902_v13, %v904_v9  ;;  %v1130_v48 = vcombine.high %v2556_v54, %v2556_v54 }
 0x33c   : > { %v913_v3 = vmul.f32 %v911_v23, %v2102_v41  ;;  %v914_v2 = vmul.f32 %v910_v31, %v2108_v29  ;;  %1317 = vmatpush1.bf16.msra.mxu0 %v1316_v52  ;;  %1331 = vmatprep.subr.bf16.mxu1 %v1330_v10 }
 0x33d   : > { %v922_v6 = vpop.permute.xlu0 %921  ;;  %1333 = vmatpush1.bf16.msra.mxu1 %v1332_v30  ;;  %v1134_v30 = vsel %vm641_vm4, %v2556_v54, 0.0  ;;  %v1135_v31 = vsel %vm641_vm4, %v1130_v48, 0.0 }
 0x33e   : > { %v1320_v43 = vpack.c.bf16 %v913_v3, %v2284_v57  ;;  %v908_v26 = vpop.permute.xlu1 %907  ;;  %v1318_v56 = vpack.c.bf16 %v914_v2, %v2290_v55 }
 0x33f   : > { %v909_v35 = vsel %vm469_vm5, %v906_v46, %v908_v26  ;;  %v912_v34 = vsel %vm469_vm5, %v908_v26, %v902_v13 }
 0x340   : > { %v915_v59 = vmul.f32 %v909_v35, %v2111_v49  ;;  %v916_v41 = vmul.f32 %v912_v34, %v2105_v44  ;;  %1319 = vmatprep.subr.bf16.mxu0 %v1318_v56 }
 0x341   : > { %v934_v29 = vpop.permute.xlu0 %933  ;;  %1321 = vmatpush1.bf16.msra.mxu0 %v1320_v43 }
 0x342   : > { %v1336_v47 = vpack.c.bf16 %v915_v59, %v2282_v36  ;;  %v920_v62 = vpop.permute.xlu1 %919  ;;  %v1334_v57 = vpack.c.bf16 %v916_v41, %v2296_v51 }
 0x343   : > { %v926_v45 = vsel %vm502_vm7, %v920_v62, %v922_v6  ;;  %v927_v49 = vsel %vm502_vm7, %v918_v58, %v920_v62 }
 0x344   : > { %1335 = vmatprep.subr.bf16.mxu1 %v1334_v57  ;;  %v929_v4 = vmul.f32 %v927_v49, %v2161_v37  ;;  %v930_v51 = vmul.f32 %v926_v45, %v2184_v28 }
 0x345   : > { %1337 = vmatpush1.bf16.msra.mxu1 %v1336_v47  ;;  %v938_v55 = vpop.permute.xlu0 %937 }
 0x346   : > { %v924_v40 = vpop.permute.xlu1 %923 }
 0x347   : > { %v925_v21 = vsel %vm502_vm7, %v922_v6, %v924_v40  ;;  %v928_v12 = vsel %vm502_vm7, %v924_v40, %v918_v58 }
 0x348   : > { %v931_v28 = vmul.f32 %v925_v21, %v2187_v42 }
 0x349   : > { %v950_v39 = vpop.permute.xlu0 %949 }
 0x34a   : > { %v936_v13 = vpop.permute.xlu1 %935 }
 0x34b   : > { %v942_v44 = vsel %vm535_vm6, %v936_v13, %v938_v55  ;;  %v943_v36 = vsel %vm535_vm6, %v934_v29, %v936_v13 }
 0x34c   : > { %v945_v14 = vmul.f32 %v943_v36, %v2130_v60  ;;  %v946_v38 = vmul.f32 %v942_v44, %v2136_v63  ;;  %v932_v60 = vmul.f32 %v928_v12, %v2181_v32 }
 0x34d   : > { %v954_v0 = vpop.permute.xlu0 %953 }
 0x34e   : > { %v1324_v8 = vpack.c.bf16 %v945_v14, %v929_v4  ;;  %v940_v46 = vpop.permute.xlu1 %939  ;;  %v1322_v17 = vpack.c.bf16 %v946_v38, %v930_v51 }
 0x34f   : > { %v941_v11 = vsel %vm535_vm6, %v938_v55, %v940_v46  ;;  %v944_v37 = vsel %vm535_vm6, %v940_v46, %v934_v29 }
 0x350   : > { %v947_v63 = vmul.f32 %v941_v11, %v2146_v27  ;;  %v948_v53 = vmul.f32 %v944_v37, %v2133_v25  ;;  %1323 = vmatprep.subr.bf16.mxu0 %v1322_v17  ;;  %v965_v27 = vld [vmem:[#allocation7] sm:$0xff] }
 0x351   : > { %1325 = vmatpush1.bf16.msra.mxu0 %v1324_v8 }
 0x352   : > { %v1340_v22 = vpack.c.bf16 %v947_v63, %v931_v28  ;;  %v952_v5 = vpop.permute.xlu1 %951  ;;  %v1338_v15 = vpack.c.bf16 %v948_v53, %v932_v60 }
 0x353   : > { %v958_v1 = vsel %vm568_vm8, %v952_v5, %v954_v0  ;;  %v959_v61 = vsel %vm568_vm8, %v950_v39, %v952_v5 }
 0x354   : > { %v961_v42 = vmul.f32 %v2265_v18, %v959_v61  ;;  %v962_v32 = vmul.f32 %v2261_v20, %v958_v1  ;;  %1339 = vmatprep.subr.bf16.mxu1 %v1338_v15 }
 0x355   : > { %1341 = vmatpush1.bf16.msra.mxu1 %v1340_v22 }
 0x356   : > { %986 = vmatprep.subr.mxu0 %v962_v32  ;;  %v956_v25 = vpop.permute.xlu1 %955 }
 0x357   : > { %v957_v7 = vsel %vm568_vm8, %v954_v0, %v956_v25  ;;  %v960_v16 = vsel %vm568_vm8, %v956_v25, %v950_v39  ;;  %987 = vmatpush1.msra.mxu0 %v961_v42 }
 0x358   : > { %v963_v24 = vmul.f32 %v2263_v50, %v957_v7  ;;  %v964_v18 = vmul.f32 %v2247_v19, %v960_v16  ;;  %1285 = vmatmul.mubr.msk.f32.vlgmr.msra.gmra.mrb[2].mxu0 %vm966_vm10, %v965_v27  ;;  %v2557_v50 = vld [vmem:[#allocation16_spill] sm:$0xff] }
 0x359   : > { %v1131_v19 = vcombine.high %v2557_v50, %v2557_v50  ;;  %v1136_v35 = vsel %vm641_vm4, %v2557_v50, 0.0 }
 0x35a   : > { %1057 = vmatprep.subr.mxu1 %v964_v18 }
 0x35b   : > { %1058 = vmatpush1.msra.mxu1 %v963_v24  ;;  %v1137_v59 = vsel %vm641_vm4, %v1131_v19, 0.0 }
 0x35c   : > { %1286 = vmatmul.mubr.msk.f32.vlgmr.msra.gmra.mrb[2].mxu1 %vm966_vm10, %v965_v27 }
 0x35e   : > { %v1114_v20 = vpop.permute.xlu0 %1113 }
 0x367   : > { %v1122_v52 = vpop.permute.xlu1 %1121 }
 0x42b   : > { %v1036_v58 = vpop.f32.mrb[2].mxu0 }
 0x42c   : > { %v1116_v9 = vmul.f32 %v1114_v20, %v1036_v58  ;;  %v1038_v10 = vpop.f32.mrb[3].mxu0 }
 0x42d   : > { %v1117_v33 = vmul.f32 %v1114_v20, %v1038_v10 }
 0x42e   : > { %v1124_v23 = vadd.f32 %v1122_v52, %v1116_v9 }
 0x42f   : > { %v1107_v3 = vpop.f32.mrb[2].mxu1  ;;  %v1125_v2 = vadd.f32 %v1122_v52, %v1117_v33 }
 0x430   : > { %v1118_v6 = vmul.f32 %v1114_v20, %v1107_v3  ;;  %v1109_v43 = vpop.f32.mrb[3].mxu1  ;;  %v1138_v26 = vadd.f32 %v1134_v30, %v1124_v23 }
 0x431   : > { %v1119_v56 = vmul.f32 %v1114_v20, %v1109_v43  ;;  %v1139_v34 = vadd.f32 %v1135_v31, %v1125_v2 }
 0x432   : > { %v1126_v41 = vadd.f32 %v1122_v52, %v1118_v6  ;;  %1142 = vst [vmem:[%s280_s10] sm:$0xff] %v1138_v26 }
 0x433   : > { %v1127_v29 = vadd.f32 %v1122_v52, %v1119_v56  ;;  %1143 = vst [vmem:[%s280_s10 + $0x8] sm:$0xff] %v1139_v34 }
 0x434   : > { %v1140_v47 = vadd.f32 %v1136_v35, %v1126_v41 }
 0x435   : > { %v1141_v62 = vadd.f32 %v1137_v59, %v1127_v29 }
 0x436   : > { %1144 = vst [vmem:[%s280_s10 + $0x10] sm:$0xff] %v1140_v47 }
 0x437   : > { %1145 = vst [vmem:[%s280_s10 + $0x18] sm:$0xff] %v1141_v62 }
 0x438   : > { %1573 = shalt.err (!%p1570_p13)
}
 0x439   : > { %s1574_s12 = scalar_lea.hbm %s2471_s9, 512  ;;  %s1578_s6 = scalar_lea.hbm %s2520_s5, 1024 }
 0x43a   : > { %p1575_p5 = scmp.ne.s32.totalorder %s2471_s9, %s1574_s12  ;;  %p1579_p11 = scmp.lt.u32.totalorder %s2471_s9, %s2520_s5 }
 0x43b   : > { %p1580_p12 = scmp.lt.u32.totalorder %s1578_s6, %s1574_s12  ;;  %p1582_p1 = scmp.lt.u32.totalorder %s1574_s12, %s2471_s9 }
 0x43c   : > { %p1576_p0 = pnand %p1575_p5, %p1831_p6 }
 0x43d   : > { %p1581_p2 = por %p1580_p12, %p1579_p11 }
 0x43e   : > { %p1577_p9 = pneg %p1576_p0 }
 0x43f   : > { %p1583_p4 = por %p1582_p1, %p1581_p2 }
 0x441   : > { %p1584_p8 = pnand %p1583_p4, %p1577_p9 }
 0x443   : > { %1587 = shalt.err (!%p1584_p8)
}
 0x444   : > { %1356 = dma.vmem_to_hbm [thread:$0]  (%p1831_p6), %s2473_s15, 512, %s2471_s9, %s1147_s24  }
 0x445 PF: > { %s1173_s10 = sand.u32 1, %s1622_s18   ;;  %p2558_p3 = scmp.ne.s32.totalorder %s2534_s25, 0 }
 0x446   : > { %p2559_p7 = scmp.ge.s32.totalorder %s1634_s21, 2  ;;  %s1174_s13 = scalar_lea.sflag [#allocation4], %s1173_s10 }
 0x448   : > { %p1373_p10 = pnand %p2559_p7, %p2558_p3 }
 0x44a   : > { %1617 = dma.done.wait (!%p1373_p10), %s1174_s13, 512  }
 0x44b   : > { %1619 = vsyncadd (!%p1373_p10), %s1174_s13, 4294966784  ;;  %p20_p13 = scmp.ge.s32.totalorder %s1817_s28, 4   ;;  %s2560_s18 = smov %s1626_s19 }
 0x44c   : > { %s2561_s19 = smov %s1630_s20  ;;  %s2562_s20 = smov %s1827_s17 }
 0x44d   : > { %s2563_s21 = smov %s1817_s28  ;;  %22 = sbr.rel (!%p20_p13) target bundleno = 7 (0x7), region = 97 }
 0x454   :  { %1179 = vsyncpa [#allocation3], 1 }
 0x455   :  { %1181 = vsyncpa [#allocation3 + $0x1], 1 }
 0x456   :  { %1182 = vsyncpa [#allocation6], 1 }
 0x457   :  { %1183 = vsyncpa [#allocation9], 1 }
 0x458   :  { %1184 = vsyncpa [#allocation4], 1 }
 0x459   :  { %1186 = vsyncpa [#allocation4 + $0x1], 1 }

</bundles_post_ra>
